<compile_context>
chip_gen: v7x
topology: tpu7x:2x2x1
jax: 0.10.0
libtpu: 0.0.40
codegen_flags: <defaults>
</compile_context>

<pallas_src>
import functools

import jax
import jax.numpy as jnp
from jax.experimental import pallas as pl
from jax.experimental.pallas import tpu as pltpu

P_DROP = 0.5
_LANE = 128
_SUBLANE_BF16 = 16

# per-dropout-site salts (fit in int32)
_SALT1 = 0x3C6EF35F
_SALT2 = 0x27D4EB2F


def _round_up(n, m):
    return ((n + m - 1) // m) * m


def _pad2(a, rows, cols):
    pr, pc = rows - a.shape[0], cols - a.shape[1]
    if pr == 0 and pc == 0:
        return a
    return jnp.pad(a, ((0, pr), (0, pc)))


def _dropout(h, p, seed, salt, row0):
    """Stateless hash-based dropout: keep prob = 1-p, survivors scaled 1/(1-p).

    Pure int32 VPU ops (mul/xor/shift/and + one compare) so it lowers on both
    Mosaic and the CPU interpreter.  Element index includes the global row
    offset -> independent masks across batch tiles / layers.
    """
    if p <= 0.0:
        return h
    rows = jax.lax.broadcasted_iota(jnp.int32, h.shape, 0)
    cols = jax.lax.broadcasted_iota(jnp.int32, h.shape, 1)
    idx = (row0 + rows) * h.shape[1] + cols
    v = idx + seed * jnp.int32(1000003) + jnp.int32(salt)
    # degski's int hash; (x >> 16) & 0xFFFF == logical shift for int32.
    v = (v ^ ((v >> 16) & 0xFFFF)) * jnp.int32(0x45D9F3B)
    v = (v ^ ((v >> 16) & 0xFFFF)) * jnp.int32(0x45D9F3B)
    v = v ^ ((v >> 16) & 0xFFFF)
    r = v & jnp.int32(0x00FFFFFF)                       # uniform 24-bit, >= 0
    thresh = jnp.int32(min(int(p * float(1 << 24)), (1 << 24) - 1))
    keep = r >= thresh                                  # P(keep) = 1 - p
    return jnp.where(keep, h * jnp.float32(1.0 / (1.0 - p)), jnp.float32(0.0))


def decoder_kernel(seed_ref,                      # scalar-prefetch (SMEM)
                   x_ref, w1_ref, b1_ref, w2_ref, b2_ref, w3_ref, b3_ref,
                   o_ref,
                   *, p_drop, tile_b):
    seed = seed_ref[0]
    row0 = pl.program_id(0) * tile_b              # global row offset of this tile

    # linear1 (bf16 MXU, f32 accum) + bias + ReLU + dropout   (all f32 elementwise)
    h = jnp.dot(x_ref[...], w1_ref[...], preferred_element_type=jnp.float32)
    h = jnp.maximum(h + b1_ref[...], 0.0)
    h = _dropout(h, p_drop, seed, _SALT1, row0)

    # linear2 + bias + ReLU + dropout
    h = jnp.dot(h.astype(w2_ref.dtype), w2_ref[...],
                preferred_element_type=jnp.float32)
    h = jnp.maximum(h + b2_ref[...], 0.0)
    h = _dropout(h, p_drop, seed, _SALT2, row0)

    # linear3 + bias + sigmoid
    logits = jnp.dot(h.astype(w3_ref.dtype), w3_ref[...],
                     preferred_element_type=jnp.float32)
    o_ref[...] = jax.nn.sigmoid(logits + b3_ref[...])


def decoder_forward(x, params, seed, *, p_drop=P_DROP, tile_b=256):
    """x: (B, z_dim) f32.  params: dict of (in,out) weights and (1,out) biases."""
    B, Z = x.shape
    w1, b1, w2, b2, w3, b3 = (params["w1"], params["b1"], params["w2"],
                              params["b2"], params["w3"], params["b3"])
    H = w1.shape[1]
    IMG = w3.shape[1]

    # Pad feature dims to 128 lanes; pick a batch tile (multiple of 16 for the
    # bf16 activation block) and pad batch to a multiple of it.
    Zp, Hp, IMGp = (_round_up(d, _LANE) for d in (Z, H, IMG))
    tile_b = max(_SUBLANE_BF16,
                 _round_up(min(int(tile_b), _round_up(B, _SUBLANE_BF16)),
                           _SUBLANE_BF16))
    Bp = _round_up(B, tile_b)
    grid = (Bp // tile_b,)

    xp = _pad2(x, Bp, Zp).astype(jnp.bfloat16)
    w1p = _pad2(w1, Zp, Hp).astype(jnp.bfloat16)
    w2p = _pad2(w2, Hp, Hp).astype(jnp.bfloat16)
    w3p = _pad2(w3, Hp, IMGp).astype(jnp.bfloat16)
    b1p = _pad2(b1, 1, Hp).astype(jnp.float32)
    b2p = _pad2(b2, 1, Hp).astype(jnp.float32)
    b3p = _pad2(b3, 1, IMGp).astype(jnp.float32)

    seed_arr = jnp.asarray([seed], dtype=jnp.int32)

    # weights/biases: constant block index -> stay resident in VMEM across tiles
    resident = lambda a: pl.BlockSpec(a.shape, lambda i, s: (0, 0))

    kernel = functools.partial(decoder_kernel, p_drop=float(p_drop),
                               tile_b=tile_b)

    # explicit VMEM budget (double-buffered io tiles + resident weights + slack)
    vmem_est = (2 * 2 * (w1p.size + w2p.size + w3p.size)
                + 2 * 4 * (b1p.size + b2p.size + b3p.size)
                + 2 * tile_b * (Zp * 2 + IMGp * 4)
                + 8 * tile_b * Hp * 4)
    vmem_limit = int(min(64 * 2**20, max(32 * 2**20, 2 * vmem_est)))

    out_padded = pl.pallas_call(
        kernel,
        out_shape=jax.ShapeDtypeStruct((Bp, IMGp), jnp.float32),
        grid_spec=pltpu.PrefetchScalarGridSpec(
            num_scalar_prefetch=1,
            grid=grid,
            in_specs=[
                pl.BlockSpec((tile_b, Zp), lambda i, s: (i, 0)),
                resident(w1p), resident(b1p),
                resident(w2p), resident(b2p),
                resident(w3p), resident(b3p),
            ],
            out_specs=pl.BlockSpec((tile_b, IMGp), lambda i, s: (i, 0)),
        ),
        compiler_params=pltpu.CompilerParams(
            dimension_semantics=("parallel",),
            vmem_limit_bytes=vmem_limit),
    )(seed_arr, xp, w1p, b1p, w2p, b2p, w3p, b3p)

    return out_padded[:B, :IMG]


def decoder_reference(x, params):
    """Pure-JAX eval-mode (no dropout) reference in f32."""
    h = jax.nn.relu(x @ params["w1"] + params["b1"])
    h = jax.nn.relu(h @ params["w2"] + params["b2"])
    return jax.nn.sigmoid(h @ params["w3"] + params["b3"])


def init_params(key, z_dim, hidden_dim, img_dim):
    """Kaiming-normal weights (std = sqrt(2/fan_in)), zero biases — matches
    nn.init.kaiming_normal_ / constant_(0.0) in the torch module."""
    k1, k2, k3 = jax.random.split(key, 3)

    def kaiming(k, fan_in, fan_out):
        std = (2.0 / fan_in) ** 0.5
        # stored as (in, out) == transpose of torch's (out, in) weight
        return jax.random.normal(k, (fan_in, fan_out), jnp.float32) * std

    return {
        "w1": kaiming(k1, z_dim, hidden_dim),
        "b1": jnp.zeros((1, hidden_dim), jnp.float32),
        "w2": kaiming(k2, hidden_dim, hidden_dim),
        "b2": jnp.zeros((1, hidden_dim), jnp.float32),
        "w3": kaiming(k3, hidden_dim, img_dim),
        "b3": jnp.zeros((1, img_dim), jnp.float32),
    }


if __name__ == "__main__":
    B, Z, H, IMG = 32, 16, 32, 64

    key = jax.random.PRNGKey(0)
    kx, kp = jax.random.split(key)
    x = jax.random.normal(kx, (B, Z), jnp.float32)
    params = init_params(kp, Z, H, IMG)

    # eval-mode check (p_drop=0) against the pure-JAX reference (bf16 matmul tol)
    out_eval = jax.block_until_ready(
        decoder_forward(x, params, seed=0, p_drop=0.0, tile_b=16))
    ref = decoder_reference(x, params)
    assert out_eval.shape == (B, IMG) and out_eval.dtype == jnp.float32
    max_err = float(jnp.max(jnp.abs(out_eval - ref)))
    assert max_err < 5e-2, max_err

    # training-mode run (dropout p=0.5); tile_b=16 -> grid of 2 batch tiles
    out_train = jax.block_until_ready(
        decoder_forward(x, params, seed=1234, p_drop=0.5, tile_b=16))
    assert out_train.shape == (B, IMG) and out_train.dtype == jnp.float32
    assert bool(jnp.all(out_train >= 0.0)) and bool(jnp.all(out_train <= 1.0))

    print("KERNEL_OK")
</pallas_src>

<mosaic_0001>
module attributes {stable_mosaic.version = 11 : i64} {
  func.func @decoder_kernel(%arg0: i32, %arg1: memref<1xi32, #tpu.memory_space<smem>>, %arg2: memref<16x128xbf16, #tpu.memory_space<vmem>>, %arg3: memref<128x128xbf16, #tpu.memory_space<vmem>>, %arg4: memref<1x128xf32, #tpu.memory_space<vmem>>, %arg5: memref<128x128xbf16, #tpu.memory_space<vmem>>, %arg6: memref<1x128xf32, #tpu.memory_space<vmem>>, %arg7: memref<128x128xbf16, #tpu.memory_space<vmem>>, %arg8: memref<1x128xf32, #tpu.memory_space<vmem>>, %arg9: memref<16x128xf32, #tpu.memory_space<vmem>>) attributes {dimension_semantics = [#tpu.dimension_semantics<parallel>], iteration_bounds = array<i64: 2>, scalar_prefetch = 1 : i64, scratch_operands = 0 : i64, tpu.core_type = #tpu.core_type<tc>, window_params = [{transform_indices = @transform_0, window_bounds = array<i64: 16, 128>}, {pipeline_mode = #tpu.pipeline_mode<synchronous>, transform_indices = @transform_1, window_bounds = array<i64: 128, 128>}, {pipeline_mode = #tpu.pipeline_mode<synchronous>, transform_indices = @transform_2, window_bounds = array<i64: 1, 128>}, {pipeline_mode = #tpu.pipeline_mode<synchronous>, transform_indices = @transform_3, window_bounds = array<i64: 128, 128>}, {pipeline_mode = #tpu.pipeline_mode<synchronous>, transform_indices = @transform_4, window_bounds = array<i64: 1, 128>}, {pipeline_mode = #tpu.pipeline_mode<synchronous>, transform_indices = @transform_5, window_bounds = array<i64: 128, 128>}, {pipeline_mode = #tpu.pipeline_mode<synchronous>, transform_indices = @transform_6, window_bounds = array<i64: 1, 128>}, {transform_indices = @transform_7, window_bounds = array<i64: 16, 128>}]} {
    %c0 = arith.constant 0 : index
    %c0_0 = arith.constant 0 : index
    %0 = vector.load %arg2[%c0, %c0_0] : memref<16x128xbf16, #tpu.memory_space<vmem>>, vector<16x128xbf16>
    %c0_1 = arith.constant 0 : index
    %c0_2 = arith.constant 0 : index
    %1 = vector.load %arg3[%c0_1, %c0_2] : memref<128x128xbf16, #tpu.memory_space<vmem>>, vector<128x128xbf16>
    %cst = arith.constant dense<0.000000e+00> : vector<16x128xf32>
    %2 = tpu.matmul %0, %1, %cst {dimension_numbers = #tpu.dot_dimension_numbers<[1], [0], [0], [1], [0, 0, 1, 1], [], []>} : vector<16x128xbf16>, vector<128x128xbf16>, vector<16x128xf32> -> vector<16x128xf32>
    %c0_3 = arith.constant 0 : index
    %c0_4 = arith.constant 0 : index
    %3 = vector.load %arg4[%c0_3, %c0_4] : memref<1x128xf32, #tpu.memory_space<vmem>>, vector<1x128xf32>
    %4 = vector.broadcast %3 : vector<1x128xf32> to vector<16x128xf32>
    %5 = arith.addf %2, %4 : vector<16x128xf32>
    %cst_5 = arith.constant 0.000000e+00 : f32
    %6 = vector.broadcast %cst_5 : f32 to vector<16x128xf32>
    %7 = arith.maximumf %5, %6 : vector<16x128xf32>
    %8 = arith.truncf %7 : vector<16x128xf32> to vector<16x128xbf16>
    %c0_6 = arith.constant 0 : index
    %c0_7 = arith.constant 0 : index
    %9 = vector.load %arg5[%c0_6, %c0_7] : memref<128x128xbf16, #tpu.memory_space<vmem>>, vector<128x128xbf16>
    %cst_8 = arith.constant dense<0.000000e+00> : vector<16x128xf32>
    %10 = tpu.matmul %8, %9, %cst_8 {dimension_numbers = #tpu.dot_dimension_numbers<[1], [0], [0], [1], [0, 0, 1, 1], [], []>} : vector<16x128xbf16>, vector<128x128xbf16>, vector<16x128xf32> -> vector<16x128xf32>
    %c0_9 = arith.constant 0 : index
    %c0_10 = arith.constant 0 : index
    %11 = vector.load %arg6[%c0_9, %c0_10] : memref<1x128xf32, #tpu.memory_space<vmem>>, vector<1x128xf32>
    %12 = vector.broadcast %11 : vector<1x128xf32> to vector<16x128xf32>
    %13 = arith.addf %10, %12 : vector<16x128xf32>
    %cst_11 = arith.constant 0.000000e+00 : f32
    %14 = vector.broadcast %cst_11 : f32 to vector<16x128xf32>
    %15 = arith.maximumf %13, %14 : vector<16x128xf32>
    %16 = arith.truncf %15 : vector<16x128xf32> to vector<16x128xbf16>
    %c0_12 = arith.constant 0 : index
    %c0_13 = arith.constant 0 : index
    %17 = vector.load %arg7[%c0_12, %c0_13] : memref<128x128xbf16, #tpu.memory_space<vmem>>, vector<128x128xbf16>
    %cst_14 = arith.constant dense<0.000000e+00> : vector<16x128xf32>
    %18 = tpu.matmul %16, %17, %cst_14 {dimension_numbers = #tpu.dot_dimension_numbers<[1], [0], [0], [1], [0, 0, 1, 1], [], []>} : vector<16x128xbf16>, vector<128x128xbf16>, vector<16x128xf32> -> vector<16x128xf32>
    %c0_15 = arith.constant 0 : index
    %c0_16 = arith.constant 0 : index
    %19 = vector.load %arg8[%c0_15, %c0_16] : memref<1x128xf32, #tpu.memory_space<vmem>>, vector<1x128xf32>
    %20 = vector.broadcast %19 : vector<1x128xf32> to vector<16x128xf32>
    %21 = arith.addf %18, %20 : vector<16x128xf32>
    %22 = arith.negf %21 : vector<16x128xf32>
    %23 = math.exp %22 : vector<16x128xf32>
    %cst_17 = arith.constant 1.000000e+00 : f32
    %24 = vector.broadcast %cst_17 : f32 to vector<16x128xf32>
    %25 = arith.addf %24, %23 : vector<16x128xf32>
    %26 = arith.divf %24, %25 : vector<16x128xf32>
    %c0_18 = arith.constant 0 : index
    %c0_19 = arith.constant 0 : index
    %27 = vector.load %arg9[%c0_18, %c0_19] : memref<16x128xf32, #tpu.memory_space<vmem>>, vector<16x128xf32>
    tpu.vector_store %arg9[%c0_18, %c0_19], %26 {strides = array<i32>} : memref<16x128xf32, #tpu.memory_space<vmem>>, vector<16x128xf32>,
    return
  }
  func.func @transform_0(%arg0: i32, %arg1: memref<1xi32, #tpu.memory_space<smem>>) -> (i32, i32) {
    %c0_i32 = arith.constant 0 : i32
    %c0_i32_0 = arith.constant 0 : i32
    return %arg0, %c0_i32 : i32, i32
  }
  func.func @transform_1(%arg0: i32, %arg1: memref<1xi32, #tpu.memory_space<smem>>) -> (i32, i32) {
    %c0_i32 = arith.constant 0 : i32
    %c0_i32_0 = arith.constant 0 : i32
    %c0_i32_1 = arith.constant 0 : i32
    return %c0_i32, %c0_i32_0 : i32, i32
  }
  func.func @transform_2(%arg0: i32, %arg1: memref<1xi32, #tpu.memory_space<smem>>) -> (i32, i32) {
    %c0_i32 = arith.constant 0 : i32
    %c0_i32_0 = arith.constant 0 : i32
    %c0_i32_1 = arith.constant 0 : i32
    return %c0_i32, %c0_i32_0 : i32, i32
  }
  func.func @transform_3(%arg0: i32, %arg1: memref<1xi32, #tpu.memory_space<smem>>) -> (i32, i32) {
    %c0_i32 = arith.constant 0 : i32
    %c0_i32_0 = arith.constant 0 : i32
    %c0_i32_1 = arith.constant 0 : i32
    return %c0_i32, %c0_i32_0 : i32, i32
  }
  func.func @transform_4(%arg0: i32, %arg1: memref<1xi32, #tpu.memory_space<smem>>) -> (i32, i32) {
    %c0_i32 = arith.constant 0 : i32
    %c0_i32_0 = arith.constant 0 : i32
    %c0_i32_1 = arith.constant 0 : i32
    return %c0_i32, %c0_i32_0 : i32, i32
  }
  func.func @transform_5(%arg0: i32, %arg1: memref<1xi32, #tpu.memory_space<smem>>) -> (i32, i32) {
    %c0_i32 = arith.constant 0 : i32
    %c0_i32_0 = arith.constant 0 : i32
    %c0_i32_1 = arith.constant 0 : i32
    return %c0_i32, %c0_i32_0 : i32, i32
  }
  func.func @transform_6(%arg0: i32, %arg1: memref<1xi32, #tpu.memory_space<smem>>) -> (i32, i32) {
    %c0_i32 = arith.constant 0 : i32
    %c0_i32_0 = arith.constant 0 : i32
    %c0_i32_1 = arith.constant 0 : i32
    return %c0_i32, %c0_i32_0 : i32, i32
  }
  func.func @transform_7(%arg0: i32, %arg1: memref<1xi32, #tpu.memory_space<smem>>) -> (i32, i32) {
    %c0_i32 = arith.constant 0 : i32
    %c0_i32_0 = arith.constant 0 : i32
    return %arg0, %c0_i32 : i32, i32
  }
}

</mosaic_0001>

<bundles_post_ra>
// kernel: tpu_custom_call.1
= control target key start
LH: loop header
LB: loop body
LE: loop exit
PB: predicated region body
PF: predicated region fallthrough
CT: control target
= control target key end

     0   :  { %14 = vsyncpa [#allocation5], 0  ;;  %s1641_s0 = inlined_call_operand.<no memory space> [shape: s32[1], index: 0, kind: input, shape index: {}]   ;;  %s1642_s1 = inlined_call_operand.hbm [shape: bf16[32,128], index: 1, kind: input, shape index: {}]   ;;  %s1643_s2 = inlined_call_operand.hbm [shape: bf16[128,128], index: 2, kind: input, shape index: {}]   ;;  %s1644_s3 = inlined_call_operand.vmem [shape: f32[1,128], index: 3, kind: input, shape index: {}]   ;;  %s1645_s4 = inlined_call_operand.hbm [shape: bf16[128,128], index: 4, kind: input, shape index: {}]   ;;  %s1646_s5 = inlined_call_operand.vmem [shape: f32[1,128], index: 5, kind: input, shape index: {}]   ;;  %s1647_s6 = inlined_call_operand.hbm [shape: bf16[128,128], index: 6, kind: input, shape index: {}]   ;;  %s1648_s7 = inlined_call_operand.vmem [shape: f32[1,128], index: 7, kind: input, shape index: {}]   ;;  %s1649_s8 = inlined_call_operand.hbm [shape: f32[32,128], index: 8, kind: output, shape index: {}]  }
   0x1   :  { %16 = vsyncpa [#allocation5 + $0x1], 0 }
   0x2   :  { %17 = vsyncpa [#allocation8], 0 }
   0x3   :  { %18 = vsyncpa [#allocation11], 0 }
   0x4   :  { %19 = vsyncpa [#allocation6], 0 }
   0x5   :  { %21 = vsyncpa [#allocation6 + $0x1], 0  ;;  %s1327_s26 = smov 0   ;;  %s1329_s27 = smov 0  }
   0x6   :  { %s1331_s28 = smov 0   ;;  %s1333_s29 = smov 0  }
   0x7 LB: > { %s1348_s30 = sadd.s32 4294967295, %s1269_s29   ;;  %s826_s9 = sadd.s32 4294967294, %s1269_s29   ;;  %s1269_s29 = sphi %s1333_s29, %s1675_s29   ;;  %s1265_s28 = sphi %s1331_s28, %s1674_s28   ;;  %s1261_s27 = sphi %s1329_s27, %s1673_s27   ;;  %s1257_s26 = sphi %s1327_s26, %s1672_s26  }
   0x8   : > { %p47_p0 = scmp.ne.s32.totalorder %s1261_s27, %s1257_s26  ;;  %p1650_p1 = scmp.eq.s32.totalorder %s1348_s30, 0 }
   0x9   : > { %p203_p3 = scmp.eq.s32.totalorder %s826_s9, 1  ;;  %p827_p5 = scmp.ge.s32.totalorder %s1269_s29, 1 }
   0xa   : > { %p1357_p4 = por %p1650_p1, %p47_p0  ;;  %p210_p7 = scmp.lt.s32.totalorder %s1269_s29, 3 }
   0xb   : > { %p1362_p6 = por %p203_p3, %p47_p0  ;;  %s1271_s13 = smov [#allocation7]  }
   0xc   : > { %s1654_s10 = scalar_select %p1357_p4, 1, 0 }
   0xd   : > { %s1655_s11 = scalar_select %p1362_p6, 1, 0 }
   0xe   : > { %p1367_p8 = pnand %p827_p5, %p210_p7  ;;  %s222_s14 = sshll.u32 %s1271_s13, 4  ;;  %s1371_s14 = int_to_ptr.vmem [resolvable:$true] %s222_s14 }
   0xf   : > { %1656 = sst [smem:[#allocation17_spill]] %s1655_s11  ;;  %s1272_s16 = smov [#allocation9]  }
  0x10   : > { %s1657_s12 = scalar_select %p1367_p8, 1, 0 }
  0x11   : > { %p981_p9 = pneg %p1367_p8  ;;  %s238_s17 = sshll.u32 %s1272_s16, 4  ;;  %s1382_s17 = int_to_ptr.vmem [resolvable:$true] %s238_s17 }
  0x12   : > { %s1273_s18 = smov [#allocation10]   ;;  %s1081_s22 = scalar_lea.hbm %s1643_s2, 1024 }
  0x13   : > { %p1378_p11 = pnand %p981_p9, %p1650_p1  ;;  %s1384_s19 = sshll.u32 %s1273_s18, 4  ;;  %s255_s19 = int_to_ptr.vmem [resolvable:$true] %s1384_s19 }
  0x14   : > { %p1082_p12 = scmp.ne.s32.totalorder %s1643_s2, %s1081_s22  ;;  %p1088_p5 = scmp.lt.u32.totalorder %s1081_s22, %s1643_s2 }
  0x15   : > { %p1394_p13 = pneg %p1378_p11 }
  0x17   : > { %p1084_p0 = pnand %p1394_p13, %p1082_p12 }
  0x19   : > { %p1085_p3 = pneg %p1084_p0 }
  0x1b   : > { %p1090_p7 = pnand %p1088_p5, %p1085_p3 }
  0x1d   : > { %1093 = shalt.err (!%p1090_p7)
}
  0x1e   : > { %s1094_s13 = scalar_lea.vmem %s1371_s14, 1024  ;;  %p1102_p2 = scmp.lt.s32.totalorder %s1371_s14, %s1371_s14 }
  0x1f   : > { %p1095_p9 = scmp.ne.s32.totalorder %s1371_s14, %s1094_s13  ;;  %p1103_p6 = scmp.lt.s32.totalorder %s1094_s13, %s1094_s13 }
  0x21   : > { %p1097_p10 = pnand %p1095_p9, %p1394_p13  ;;  %p1104_p12 = por %p1103_p6, %p1102_p2 }
  0x23   : > { %p1098_p1 = pneg %p1097_p10 }
  0x25   : > { %p1105_p0 = pnand %p1104_p12, %p1098_p1 }
  0x27   : > { %1108 = shalt.err (!%p1105_p0)
}
  0x28   : > { %s1274_s16 = smov 64   ;;  %s1275_s18 = smov 4  }
  0x29   : > { %984 = dma.hbm_to_vmem [thread:$0]  (!%p1378_p11), %s1643_s2, 1024, %s1371_s14, [#allocation8], %s1274_s16, %s1274_s16, %s1275_s18  }
  0x2a   : > { %s1109_s0 = scalar_lea.hbm %s1645_s4, 1024 }
  0x2b   : > { %p1110_p1 = scmp.ne.s32.totalorder %s1645_s4, %s1109_s0  ;;  %p1116_p10 = scmp.lt.u32.totalorder %s1109_s0, %s1645_s4 }
  0x2d   : > { %p1112_p2 = pnand %p1110_p1, %p1394_p13 }
  0x2f   : > { %p1113_p6 = pneg %p1112_p2 }
  0x31   : > { %p1118_p3 = pnand %p1116_p10, %p1113_p6 }
  0x33   : > { %1121 = shalt.err (!%p1118_p3)
}
  0x34   : > { %s1122_s14 = scalar_lea.vmem %s1382_s17, 1024  ;;  %p1130_p12 = scmp.lt.s32.totalorder %s1382_s17, %s1382_s17 }
  0x35   : > { %p1123_p5 = scmp.ne.s32.totalorder %s1382_s17, %s1122_s14  ;;  %p1131_p0 = scmp.lt.s32.totalorder %s1122_s14, %s1122_s14 }
  0x37   : > { %p1125_p7 = pnand %p1123_p5, %p1394_p13  ;;  %p1132_p1 = por %p1131_p0, %p1130_p12 }
  0x39   : > { %p1126_p9 = pneg %p1125_p7 }
  0x3b   : > { %p1133_p2 = pnand %p1132_p1, %p1126_p9 }
  0x3d   : > { %1136 = shalt.err (!%p1133_p2)
}
  0x3e   : > { %987 = dma.hbm_to_vmem [thread:$0]  (!%p1378_p11), %s1645_s4, 1024, %s1382_s17, [#allocation8], %s1274_s16, %s1274_s16, %s1275_s18  }
  0x3f   : > { %s1137_s23 = scalar_lea.hbm %s1647_s6, 1024 }
  0x40   : > { %p1138_p6 = scmp.ne.s32.totalorder %s1647_s6, %s1137_s23  ;;  %p1144_p5 = scmp.lt.u32.totalorder %s1137_s23, %s1647_s6 }
  0x42   : > { %p1140_p10 = pnand %p1138_p6, %p1394_p13 }
  0x44   : > { %p1141_p3 = pneg %p1140_p10 }
  0x46   : > { %p1146_p7 = pnand %p1144_p5, %p1141_p3 }
  0x48   : > { %1149 = shalt.err (!%p1146_p7)
}
  0x49   : > { %s1150_s14 = scalar_lea.vmem %s255_s19, 1024  ;;  %p1158_p1 = scmp.lt.s32.totalorder %s255_s19, %s255_s19 }
  0x4a   : > { %p1151_p9 = scmp.ne.s32.totalorder %s255_s19, %s1150_s14  ;;  %p1159_p2 = scmp.lt.s32.totalorder %s1150_s14, %s1150_s14 }
  0x4c   : > { %p1153_p12 = pnand %p1151_p9, %p1394_p13  ;;  %p1160_p4 = por %p1159_p2, %p1158_p1 }
  0x4e   : > { %p1154_p0 = pneg %p1153_p12 }
  0x50   : > { %p1161_p8 = pnand %p1160_p4, %p1154_p0 }
  0x52   : > { %1164 = shalt.err (!%p1161_p8)
}
  0x53   : > { %990 = dma.hbm_to_vmem [thread:$0]  (!%p1378_p11), %s1647_s6, 1024, %s255_s19, [#allocation11], %s1274_s16, %s1274_s16, %s1275_s18  }
  0x54   : > { %s1467_s24 = sadd.s32 1, %s1269_s29   ;;  %s34_s20 = sadd.s32 1, %s1265_s28 }
  0x55   : > { %s31_s15 = ssub.s32 %s1269_s29, %s1467_s24  ;;  %p41_p8 = scmp.ne.s32.totalorder %s1265_s28, %s1261_s27 }
  0x56   : > { %p32_p4 = scmp.eq.s32.totalorder %s31_s15, 0  ;;  %p42_p13 = scmp.eq.s32.totalorder %s1269_s29, 0 }
  0x57   : > { %p1002_p6 = scmp.lt.s32.totalorder %s1269_s29, 2  ;;  %p1660_p3 = scmp.eq.s32.totalorder %s1348_s30, 1 }
  0x58   : > { %s1477_s21 = scalar_select %p32_p4, %s1265_s28, %s34_s20  }
  0x59   : > { %p43_p10 = por %p42_p13, %p41_p8  ;;  %p1481_p5 = por %p1660_p3, %p41_p8 }
  0x5a   : > { %s271_s23 = sand.u32 1, %s1265_s28   ;;  %s876_s0 = sshll.u32 %s1269_s29, 7 }
  0x5b   : > { %s832_s19 = sshll.u32 %s271_s23, 3  ;;  %s1490_s13 = scalar_lea.hbm %s1642_s1, %s876_s0 }
  0x5c   : > { %s275_s14 = scalar_lea.vmem [#allocation4], %s832_s19  ;;  %p1492_p11 = pnand %p1002_p6, %p43_p10 }
  0x5d   : > { %s282_s17 = sshll.u32 %s275_s14, 4  ;;  %s1498_s15 = scalar_lea.sflag [#allocation5], %s271_s23  ;;  %s1496_s17 = int_to_ptr.vmem [resolvable:$true] %s282_s17 }
  0x5e   : > { %s1165_s20 = scalar_lea.hbm %s1490_s13, 128  ;;  %p1167_p9 = pneg %p1492_p11 }
  0x5f   : > { %p1166_p7 = scmp.ne.s32.totalorder %s1490_s13, %s1165_s20  ;;  %s1170_s25 = scalar_lea.hbm %s1642_s1, 256 }
  0x60   : > { %p1171_p1 = scmp.lt.u32.totalorder %s1490_s13, %s1642_s1  ;;  %p1172_p2 = scmp.lt.u32.totalorder %s1170_s25, %s1165_s20 }
  0x61   : > { %p1168_p12 = pnand %p1167_p9, %p1166_p7  ;;  %p1174_p8 = scmp.lt.u32.totalorder %s1165_s20, %s1490_s13 }
  0x62   : > { %p1173_p4 = por %p1172_p2, %p1171_p1 }
  0x63   : > { %p1169_p0 = pneg %p1168_p12 }
  0x64   : > { %p1175_p13 = por %p1174_p8, %p1173_p4 }
  0x66   : > { %p1176_p6 = pnand %p1175_p13, %p1169_p0 }
  0x68   : > { %1179 = shalt.err (!%p1176_p6)
}
  0x69   : > { %s1180_s23 = scalar_lea.vmem %s1496_s17, 128  ;;  %s1276_s0 = smov [#allocation4]  }
  0x6a   : > { %p1181_p10 = scmp.ne.s32.totalorder %s1496_s17, %s1180_s23  ;;  %s1185_s19 = sshll.u32 %s1276_s0, 4  ;;  %s1186_s19 = int_to_ptr.vmem [resolvable:$false] %s1185_s19 }
  0x6b   : > { %s1187_s9 = scalar_lea.vmem %s1186_s19, 256  ;;  %p1188_p12 = scmp.lt.s32.totalorder %s1496_s17, %s1186_s19 }
  0x6c   : > { %p1183_p3 = pnand %p1181_p10, %p1167_p9  ;;  %p1189_p1 = scmp.lt.s32.totalorder %s1187_s9, %s1180_s23 }
  0x6e   : > { %p1184_p7 = pneg %p1183_p3  ;;  %p1190_p2 = por %p1189_p1, %p1188_p12 }
  0x70   : > { %p1191_p4 = pnand %p1190_p2, %p1184_p7 }
  0x72   : > { %1194 = shalt.err (!%p1191_p4)
}
  0x73   : > { %994 = dma.hbm_to_vmem [thread:$0]  (!%p1492_p11), %s1490_s13, 128, %s1496_s17, %s1498_s15, %s1274_s16, %s1274_s16, %s1275_s18  }
  0x74   : > { %p1663_p9 = scmp.ne.s32.totalorder %s1657_s12, 0 }
  0x75   : > { %s1532_s20 = sand.u32 (!%p1663_p9), 1, %s1261_s27   ;;  %p1664_p0 = scmp.ne.s32.totalorder (!%p1663_p9), %s1654_s10, 0 }
  0x76   : > { %294 = sbr.rel (%p1663_p9) target bundleno = 864 (0x360), region = 48  ;;  %s836_s25 = sshll.u32 (!%p1663_p9), %s1532_s20, 3 }
  0x77   : > { %s297_s14 = scalar_lea.sflag (!%p1663_p9), [#allocation5], %s1532_s20  ;;  %s1536_s23 = scalar_lea.vmem (!%p1663_p9), [#allocation4], %s836_s25 }
  0x7d   : > { %1240 = dma.done.wait (%p1664_p0), %s297_s14, 128  }
  0x7e   : > { %1242 = vsyncadd (%p1664_p0), %s297_s14, 4294967168  ;;  %p1665_p11 = scmp.eq.s32.totalorder %s1348_s30, 0 }
  0x80   : > { %1244 = dma.done.wait (%p1665_p11), [#allocation8], 2048   ;;  %p1666_p8 = pmov %p1665_p11 }
  0x82   : > { %1246 = vsyncadd (%p1666_p8), [#allocation8], 4294965248  ;;  %p1667_p13 = pmov %p1666_p8 }
  0x83   : > { %p1668_p6 = pmov %p1666_p8 }
  0x84   : > { %1248 = dma.done.wait (%p1667_p13), [#allocation11], 1024  }
  0x85   : > { %1250 = vsyncadd (%p1668_p6), [#allocation11], 4294966272  ;;  %v1277_v0 = vmov 0.0   ;;  %vm1278_vm0 = vmmov 0   ;;  %v1048_v1 = vld [vmem:[#allocation7] sm:$0xff]   ;;  %v1049_v2 = vld [vmem:[#allocation7 + $0x8] sm:$0xff]  }
  0x86   : > { %905 = vmatprep.subr.bf16.mxu0 %v1277_v0  ;;  %921 = vmatprep.mubr.msk.bf16.mxu0 %vm1278_vm0, %v1277_v0  ;;  %v1050_v3 = vld [vmem:[#allocation7 + $0x10] sm:$0xff]   ;;  %v1057_v4 = vld [vmem:[#allocation9] sm:$0xff]   ;;  %v1051_v5 = vld [vmem:[#allocation7 + $0x18] sm:$0xff]   ;;  %s840_s11 = sshll.u32 %s1532_s20, 4  ;;  %s877_s15 = sshll.u32 %s1348_s30, 8 }
  0x87   : > { %925 = vmatprep.subr.bf16.mxu1 %v1277_v0  ;;  %941 = vmatprep.mubr.msk.bf16.mxu1 %vm1278_vm0, %v1277_v0  ;;  %v1058_v6 = vld [vmem:[#allocation9 + $0x8] sm:$0xff]   ;;  %v1052_v7 = vld [vmem:[#allocation7 + $0x20] sm:$0xff]   ;;  %v1059_v8 = vld [vmem:[#allocation9 + $0x10] sm:$0xff]   ;;  %s342_s0 = scalar_lea.vmem [#allocation12], %s840_s11  ;;  %s1595_s14 = scalar_lea.hbm %s1649_s8, %s877_s15 }
  0x88   : > { %906 = vmatpush3.bf16.msra.mxu0 %v1048_v1  ;;  %926 = vmatpush3.bf16.msra.mxu1 %v1057_v4  ;;  %v1053_v9 = vld [vmem:[#allocation7 + $0x28] sm:$0xff]   ;;  %v1060_v10 = vld [vmem:[#allocation9 + $0x18] sm:$0xff]   ;;  %v1054_v11 = vld [vmem:[#allocation7 + $0x30] sm:$0xff]   ;;  %s724_s19 = sshll.u32 %s342_s0, 4  ;;  %s1279_s30 = smov [#allocation12]   ;;  %s1597_s19 = int_to_ptr.vmem [resolvable:$true] %s724_s19 }
  0x89   : > { %907 = vmatprep.subr.bf16.mxu0 %v1277_v0  ;;  %927 = vmatprep.subr.bf16.mxu1 %v1277_v0  ;;  %v1061_v12 = vld [vmem:[#allocation9 + $0x20] sm:$0xff]   ;;  %v1055_v13 = vld [vmem:[#allocation7 + $0x38] sm:$0xff]   ;;  %v1062_v14 = vld [vmem:[#allocation9 + $0x28] sm:$0xff]   ;;  %s1195_s10 = scalar_lea.vmem %s1597_s19, 256  ;;  %s1199_s12 = sshll.u32 %s1279_s30, 4  ;;  %s1200_s12 = int_to_ptr.vmem [resolvable:$false] %s1199_s12 }
  0x8a   : > { %v1056_v15 = vld [vmem:[%s1536_s23] sm:$0xff]   ;;  %v1065_v18 = vld [vmem:[#allocation10] sm:$0xff]   ;;  %v1066_v19 = vld [vmem:[#allocation10 + $0x8] sm:$0xff]   ;;  %s711_s23 = scalar_lea.sflag [#allocation6], %s1532_s20  ;;  %p1196_p10 = scmp.ne.s32.totalorder %s1597_s19, %s1195_s10 }
  0x8b   : > { %v1063_v16 = vld [vmem:[#allocation9 + $0x30] sm:$0xff]   ;;  %v1064_v17 = vld [vmem:[#allocation9 + $0x38] sm:$0xff]   ;;  %v1069_v22 = vld [vmem:[#allocation10 + $0x20] sm:$0xff]   ;;  %s1201_s16 = scalar_lea.vmem %s1200_s12, 512  ;;  %p1202_p12 = scmp.lt.s32.totalorder %s1597_s19, %s1200_s12 }
  0x8c   : > { %908 = vmatpush3.bf16.msra.mxu0 %v1049_v2  ;;  %928 = vmatpush3.bf16.msra.mxu1 %v1058_v6  ;;  %v1067_v20 = vld [vmem:[#allocation10 + $0x10] sm:$0xff]   ;;  %v1068_v21 = vld [vmem:[#allocation10 + $0x18] sm:$0xff]   ;;  %v1070_v23 = vld [vmem:[#allocation10 + $0x28] sm:$0xff]   ;;  %p1197_p3 = pnand %p1196_p10, %p1481_p5  ;;  %p1203_p1 = scmp.lt.s32.totalorder %s1201_s16, %s1195_s10 }
  0x8d   : > { %909 = vmatprep.subr.bf16.mxu0 %v1277_v0  ;;  %929 = vmatprep.subr.bf16.mxu1 %v1277_v0  ;;  %v841_v24 = vld [vmem:[%s1644_s3] ss:$0 sm:$0xff]  ;;  %v1072_v35 = vld [vmem:[#allocation10 + $0x38] sm:$0xff]  }
  0x8e   : > { %v1071_v34 = vld [vmem:[#allocation10 + $0x30] sm:$0xff]   ;;  %p1198_p7 = pneg %p1197_p3  ;;  %p1204_p2 = por %p1203_p1, %p1202_p12 }
  0x8f   : > { %v851_v36 = vld [vmem:[%s1646_s5] ss:$0 sm:$0xff] }
  0x90   : > { %910 = vmatpush3.bf16.msra.mxu0 %v1050_v3  ;;  %930 = vmatpush3.bf16.msra.mxu1 %v1059_v8  ;;  %v860_v46 = vld [vmem:[%s1648_s7] ss:$0 sm:$0xff]  ;;  %p1205_p4 = pnand %p1204_p2, %p1198_p7 }
  0x91   : > { %911 = vmatprep.subr.bf16.mxu0 %v1277_v0  ;;  %931 = vmatprep.subr.bf16.mxu1 %v1277_v0 }
  0x94   : > { %912 = vmatpush3.bf16.msra.mxu0 %v1051_v5  ;;  %932 = vmatpush3.bf16.msra.mxu1 %v1060_v10 }
  0x95   : > { %913 = vmatprep.subr.bf16.mxu0 %v1277_v0  ;;  %933 = vmatprep.subr.bf16.mxu1 %v1277_v0 }
  0x98   : > { %914 = vmatpush3.bf16.msra.mxu0 %v1052_v7  ;;  %934 = vmatpush3.bf16.msra.mxu1 %v1061_v12 }
  0x99   : > { %915 = vmatprep.subr.bf16.mxu0 %v1277_v0  ;;  %935 = vmatprep.subr.bf16.mxu1 %v1277_v0 }
  0x9c   : > { %916 = vmatpush3.bf16.msra.mxu0 %v1053_v9  ;;  %936 = vmatpush3.bf16.msra.mxu1 %v1062_v14 }
  0x9d   : > { %917 = vmatprep.subr.bf16.mxu0 %v1277_v0  ;;  %937 = vmatprep.subr.bf16.mxu1 %v1277_v0 }
  0xa0   : > { %918 = vmatpush3.bf16.msra.mxu0 %v1054_v11  ;;  %938 = vmatpush3.bf16.msra.mxu1 %v1063_v16 }
  0xa1   : > { %919 = vmatprep.subr.bf16.mxu0 %v1277_v0  ;;  %939 = vmatprep.subr.bf16.mxu1 %v1277_v0 }
  0xa4   : > { %920 = vmatpush3.bf16.msra.mxu0 %v1055_v13  ;;  %940 = vmatpush3.bf16.msra.mxu1 %v1064_v17 }
  0xa5   : > { %945 = vmatprep.subr.bf16.mxu0 %v1277_v0 }
  0xa7   : > { %922 = vmatmul.mubr.bf16.vlgmr.msra.gmra.mrb[0].mxu0 %v1056_v15 }
  0xa8   : > { %961 = vmatprep.mubr.msk.bf16.mxu0 %vm1278_vm0, %v1277_v0  ;;  %946 = vmatpush3.bf16.msra.mxu0 %v1065_v18 }
  0xa9   : > { %947 = vmatprep.subr.bf16.mxu0 %v1277_v0 }
  0xac   : > { %948 = vmatpush3.bf16.msra.mxu0 %v1066_v19 }
  0xad   : > { %949 = vmatprep.subr.bf16.mxu0 %v1277_v0 }
  0xb0   : > { %950 = vmatpush3.bf16.msra.mxu0 %v1067_v20 }
  0xb1   : > { %951 = vmatprep.subr.bf16.mxu0 %v1277_v0 }
  0xb4   : > { %952 = vmatpush3.bf16.msra.mxu0 %v1068_v21 }
  0xb5   : > { %953 = vmatprep.subr.bf16.mxu0 %v1277_v0 }
  0xb8   : > { %954 = vmatpush3.bf16.msra.mxu0 %v1069_v22 }
  0xb9   : > { %955 = vmatprep.subr.bf16.mxu0 %v1277_v0 }
  0xbc   : > { %956 = vmatpush3.bf16.msra.mxu0 %v1070_v23 }
  0xbd   : > { %957 = vmatprep.subr.bf16.mxu0 %v1277_v0 }
  0xc0   : > { %958 = vmatpush3.bf16.msra.mxu0 %v1071_v34 }
  0xc1   : > { %959 = vmatprep.subr.bf16.mxu0 %v1277_v0 }
  0xc4   : > { %960 = vmatpush3.bf16.msra.mxu0 %v1072_v35 }
 0x17a   : > { %v459_v25 = vpop.f32.mrb[0].mxu0 }
 0x17b   : > { %v460_v26 = vadd.f32 %v841_v24, %v459_v25  ;;  %v923_v27 = vpop.f32.mrb[1].mxu0 }
 0x17c   : > { %v462_v28 = vpop.f32.mrb[2].mxu0 }
 0x17d   : > { %v463_v29 = vadd.f32 %v841_v24, %v462_v28  ;;  %v924_v30 = vpop.f32.mrb[3].mxu0  ;;  %v466_v31 = vmax.f32 %v460_v26, 0.0 }
 0x17f   : > { %v467_v32 = vmax.f32 %v463_v29, 0.0 }
 0x181   : > { %v468_v33 = vpack.c.bf16 %v467_v32, %v466_v31 }
 0x183   : > { %942 = vmatmul.mubr.bf16.vlgmr.msra.gmra.mrb[0].mxu1 %v468_v33 }
 0x256   : > { %v574_v37 = vpop.f32.mrb[0].mxu1 }
 0x257   : > { %v575_v38 = vadd.f32 %v851_v36, %v574_v37  ;;  %v943_v39 = vpop.f32.mrb[1].mxu1 }
 0x258   : > { %v577_v40 = vpop.f32.mrb[2].mxu1 }
 0x259   : > { %v578_v41 = vadd.f32 %v851_v36, %v577_v40  ;;  %v944_v42 = vpop.f32.mrb[3].mxu1  ;;  %v581_v43 = vmax.f32 %v575_v38, 0.0 }
 0x25b   : > { %v582_v44 = vmax.f32 %v578_v41, 0.0 }
 0x25d   : > { %v583_v45 = vpack.c.bf16 %v582_v44, %v581_v43 }
 0x25f   : > { %962 = vmatmul.mubr.bf16.vlgmr.msra.gmra.mrb[4].mxu0 %v583_v45 }
 0x332   : > { %v689_v47 = vpop.f32.mrb[4].mxu0 }
 0x333   : > { %v690_v48 = vadd.f32 %v860_v46, %v689_v47  ;;  %v963_v49 = vpop.f32.mrb[5].mxu0 }
 0x334   : > { %v692_v50 = vpop.f32.mrb[6].mxu0 }
 0x335   : > { %v869_v51 = vmul.f32 -1.442695, %v690_v48  ;;  %v693_v52 = vadd.f32 %v860_v46, %v692_v50  ;;  %v964_v53 = vpop.f32.mrb[7].mxu0 }
 0x337   : > { %1073 = vpow2.f32 %v869_v51  ;;  %v870_v54 = vmul.f32 -1.442695, %v693_v52 }
 0x339   : > { %1075 = vpow2.f32 %v870_v54 }
 0x341   : > { %v1074_v55 = vpop.eup %1073 }
 0x342   : > { %v702_v56 = vadd.f32 1.0, %v1074_v55 }
 0x343   : > { %v1076_v57 = vpop.eup %1075 }
 0x344   : > { %1077 = vrcp.f32 %v702_v56  ;;  %v703_v58 = vadd.f32 1.0, %v1076_v57 }
 0x346   : > { %1079 = vrcp.f32 %v703_v58 }
 0x34e   : > { %v1078_v59 = vpop.eup %1077 }
 0x34f   : > { %708 = vst [vmem:[%s342_s0] sm:$0xff] %v1078_v59 }
 0x350   : > { %v1080_v60 = vpop.eup %1079 }
 0x351   : > { %709 = vst [vmem:[%s342_s0 + $0x8] sm:$0xff] %v1080_v60 }
 0x352   : > { %1208 = shalt.err (!%p1205_p4)
}
 0x353   : > { %s1209_s18 = scalar_lea.hbm %s1595_s14, 256  ;;  %s1213_s11 = scalar_lea.hbm %s1649_s8, 512 }
 0x354   : > { %p1210_p9 = scmp.ne.s32.totalorder %s1595_s14, %s1209_s18  ;;  %p1214_p8 = scmp.lt.u32.totalorder %s1595_s14, %s1649_s8 }
 0x355   : > { %p1215_p13 = scmp.lt.u32.totalorder %s1213_s11, %s1209_s18  ;;  %p1217_p10 = scmp.lt.u32.totalorder %s1209_s18, %s1595_s14 }
 0x356   : > { %p1211_p0 = pnand %p1210_p9, %p1481_p5 }
 0x357   : > { %p1216_p6 = por %p1215_p13, %p1214_p8 }
 0x358   : > { %p1212_p11 = pneg %p1211_p0 }
 0x359   : > { %p1218_p3 = por %p1217_p10, %p1216_p6 }
 0x35b   : > { %p1219_p7 = pnand %p1218_p3, %p1212_p11 }
 0x35d   : > { %1222 = shalt.err (!%p1219_p7)
}
 0x35e   : > { %s1280_s9 = smov 128   ;;  %s1281_s25 = smov 8  }
 0x35f   : > { %979 = dma.vmem_to_hbm [thread:$0]  (%p1481_p5), %s1597_s19, 256, %s1595_s14, %s711_s23, %s1280_s9, %s1280_s9, %s1281_s25  }
 0x360 PF: > { %s1669_s10 = sld [smem:[#allocation17_spill]]  ;;  %s739_s30 = sand.u32 1, %s1257_s26  }
 0x361   : > { %p1671_p1 = scmp.ge.s32.totalorder %s1269_s29, 2  ;;  %s740_s12 = scalar_lea.sflag [#allocation6], %s739_s30 }
 0x366   : > { %p1670_p12 = scmp.ne.s32.totalorder %s1669_s10, 0 }
 0x368   : > { %p996_p2 = pnand %p1671_p1, %p1670_p12 }
 0x36a   : > { %1252 = dma.done.wait (!%p996_p2), %s740_s12, 256  }
 0x36b   : > { %1254 = vsyncadd (!%p996_p2), %s740_s12, 4294967040  ;;  %p24_p4 = scmp.ge.s32.totalorder %s1467_s24, 4   ;;  %s1672_s26 = smov %s1261_s27 }
 0x36c   : > { %s1673_s27 = smov %s1265_s28  ;;  %s1674_s28 = smov %s1477_s21 }
 0x36d   : > { %s1675_s29 = smov %s1467_s24  ;;  %26 = sbr.rel (!%p24_p4) target bundleno = 7 (0x7), region = 105 }
 0x374   :  { %745 = vsyncpa [#allocation5], 1 }
 0x375   :  { %747 = vsyncpa [#allocation5 + $0x1], 1 }
 0x376   :  { %748 = vsyncpa [#allocation8], 1 }
 0x377   :  { %749 = vsyncpa [#allocation11], 1 }
 0x378   :  { %750 = vsyncpa [#allocation6], 1 }
 0x379   :  { %752 = vsyncpa [#allocation6 + $0x1], 1 }

</bundles_post_ra>
